<compile_context>
chip_gen: v6e
topology: v6e:2x2x1
jax: 0.10.0
libtpu: 0.0.40
codegen_flags: <defaults>
</compile_context>

<pallas_src>
import jax
import jax.numpy as jnp
from jax.experimental import pallas as pl
from jax.experimental.pallas import tpu as pltpu


_LANE = 128
_MAX_HW_TILE = 8192          # caps the unrolled per-128-lane accumulate loop at 64 chunks


def _vmem_budget():
    """Returns (per-buffer tile byte target, vmem_limit_bytes) keyed off physical VMEM."""
    cap = 64 * 1024 * 1024
    try:
        info = pltpu.get_tpu_info()
        cap = int(getattr(info, "vmem_capacity_bytes", cap))
    except Exception:
        pass
    if cap >= 128 * 1024 * 1024:                       # v5e / v6e: plenty of VMEM headroom
        return 16 * 1024 * 1024, 96 * 1024 * 1024
    return 8 * 1024 * 1024, 40 * 1024 * 1024           # v7x: 64 MiB physical


def _pick_hw_tile(chan, elem_bytes, hw, tile_bytes_target):
    """Largest 128-multiple spatial tile with chan*tile*elem_bytes <= target,
    clamped to [_LANE, _MAX_HW_TILE] and to the 128-aligned HW extent."""
    hw_lane = pl.cdiv(hw, _LANE) * _LANE
    t = tile_bytes_target // max(1, chan * elem_bytes)
    t = max(_LANE, (t // _LANE) * _LANE)
    return int(min(t, _MAX_HW_TILE, hw_lane))


def _make_gap_cns_kernel(hw, tile_in, cin, needs_mask):
    """Stage 1: streaming GAP reduction with fused 1x1-conv + BN + SiLU finalize.

    Refs: x (1, Cin, tile_in), w (Cout, Cin), scale/shift (Cout, 1),
          y_out (1, Cout, 1) [resident across the HW axis], acc scratch (Cin, 128) f32.
    """
    num_chunks = tile_in // _LANE
    inv_hw = 1.0 / float(hw)

    def kernel(x_ref, w_ref, scale_ref, shift_ref, y_ref, acc_ref):
        t = pl.program_id(1)

        @pl.when(t == 0)
        def _():
            acc_ref[...] = jnp.zeros_like(acc_ref)

        base = t * tile_in
        # Lane-dense VPU accumulation: unrolled static 128-lane slices of the tile.
        for c in range(num_chunks):
            chunk = x_ref[0, :, c * _LANE:(c + 1) * _LANE].astype(jnp.float32)  # (Cin, 128)
            if needs_mask:
                lane = jax.lax.broadcasted_iota(jnp.int32, (cin, _LANE), 1)
                chunk = jnp.where(lane + (base + c * _LANE) < hw, chunk, 0.0)
            acc_ref[...] += chunk

        @pl.when(t == pl.num_programs(1) - 1)
        def _():
            w = w_ref[...].astype(jnp.float32)                                   # (Cout, Cin)
            # Keep 128 lanes dense through the matmul; single cross-lane reduce per image.
            prod = jnp.dot(w, acc_ref[...], preferred_element_type=jnp.float32)  # (Cout, 128)
            y = jnp.sum(prod, axis=1, keepdims=True) * inv_hw                    # (Cout, 1)
            y = y * scale_ref[...] + shift_ref[...]                              # fused BN
            y = y * (1.0 / (1.0 + jnp.exp(-y)))                                  # SiLU
            y_ref[0] = y

    return kernel


def _broadcast_kernel(y_ref, o_ref):
    # Stage 2: broadcast the activated (Cout, 1) vector across a lane-dense
    # (Cout, tile_out) output tile. Only HBM traffic is the (possibly masked) write.
    o_ref[0] = jnp.broadcast_to(y_ref[0], o_ref.shape[1:]).astype(o_ref.dtype)


def aspp_pooling(x, w, scale, shift):
    """x: [N, Cin, H, W]. w: [Cout, Cin] 1x1-conv weight. scale/shift: fused BN (eval).
    Returns [N, Cout, H, W] (same dtype as x)."""
    N, Cin, H, W = x.shape
    Cout = w.shape[0]
    HW = H * W
    dtype = x.dtype
    itemsize = jnp.dtype(dtype).itemsize
    tile_target, vmem_limit = _vmem_budget()

    x_flat = x.reshape(N, Cin, HW)                      # no padding: tail masked in-kernel
    scale2 = scale.astype(jnp.float32).reshape(Cout, 1)
    shift2 = shift.astype(jnp.float32).reshape(Cout, 1)

    # -------- Stage 1: tiled GAP reduction + fused 1x1 conv + BN + SiLU --------
    tile_in = _pick_hw_tile(Cin, itemsize, HW, tile_target)
    t_in = pl.cdiv(HW, tile_in)
    needs_mask = (HW % tile_in) != 0

    y = pl.pallas_call(
        _make_gap_cns_kernel(HW, tile_in, Cin, needs_mask),
        out_shape=jax.ShapeDtypeStruct((N, Cout, 1), jnp.float32),
        grid_spec=pltpu.PrefetchScalarGridSpec(
            num_scalar_prefetch=0,
            grid=(N, t_in),                                         # reduction axis last
            in_specs=[
                pl.BlockSpec((1, Cin, tile_in), lambda n, t: (n, 0, t)),
                pl.BlockSpec((Cout, Cin), lambda n, t: (0, 0)),
                pl.BlockSpec((Cout, 1), lambda n, t: (0, 0)),
                pl.BlockSpec((Cout, 1), lambda n, t: (0, 0)),
            ],
            out_specs=pl.BlockSpec((1, Cout, 1), lambda n, t: (n, 0, 0)),
            scratch_shapes=[pltpu.VMEM((Cin, _LANE), jnp.float32)],
        ),
        compiler_params=pltpu.CompilerParams(
            dimension_semantics=("parallel", "arbitrary"),
            vmem_limit_bytes=vmem_limit),
        cost_estimate=pl.CostEstimate(
            flops=int(N * (Cin * HW + 2 * Cout * Cin * _LANE)),
            transcendentals=int(N * Cout),
            bytes_accessed=int(N * Cin * HW * itemsize + N * Cout * 4)),
    )(x_flat, w, scale2, shift2)

    # -------- Stage 2: lane-dense broadcast/store directly into (N, Cout, HW) --------
    tile_out = _pick_hw_tile(Cout, itemsize, HW, tile_target)
    t_out = pl.cdiv(HW, tile_out)

    out_flat = pl.pallas_call(
        _broadcast_kernel,
        out_shape=jax.ShapeDtypeStruct((N, Cout, HW), dtype),       # exact: no pad, no slice
        grid_spec=pltpu.PrefetchScalarGridSpec(
            num_scalar_prefetch=0,
            grid=(N, t_out),
            in_specs=[pl.BlockSpec((1, Cout, 1), lambda n, t: (n, 0, 0))],
            out_specs=pl.BlockSpec((1, Cout, tile_out), lambda n, t: (n, 0, t)),
        ),
        compiler_params=pltpu.CompilerParams(
            dimension_semantics=("parallel", "parallel"),           # shard HW tiles on v7x
            vmem_limit_bytes=vmem_limit),
        cost_estimate=pl.CostEstimate(
            flops=0, transcendentals=0,
            bytes_accessed=int(N * Cout * 4 + N * Cout * HW * itemsize)),
    )(y)

    return out_flat.reshape(N, Cout, H, W)                          # free: metadata only


def _reference(x, w, scale, shift):
    # Pure-JAX reference of the same math for a correctness check.
    mean = jnp.mean(x, axis=(2, 3))                                  # [N, Cin]
    y = mean @ w.T                                                   # [N, Cout]
    y = y * scale[None, :] + shift[None, :]
    y = y * jax.nn.sigmoid(y)
    N, _, H, W = x.shape
    return jnp.broadcast_to(y[:, :, None, None], (N, y.shape[1], H, W))


if __name__ == "__main__":
    key = jax.random.PRNGKey(0)
    N, Cin, Cout = 2, 4, 8
    k_x, k_w, k_g, k_b, k_m, k_v, k_x2 = jax.random.split(key, 7)

    # Deterministic synthetic parameters (CNS = Conv1x1(no bias) + BN + SiLU).
    w = jax.random.normal(k_w, (Cout, Cin), dtype=jnp.float32) * 0.1
    gamma = 1.0 + 0.1 * jax.random.normal(k_g, (Cout,), dtype=jnp.float32)
    beta = 0.1 * jax.random.normal(k_b, (Cout,), dtype=jnp.float32)
    running_mean = 0.1 * jax.random.normal(k_m, (Cout,), dtype=jnp.float32)
    running_var = jnp.abs(1.0 + 0.1 * jax.random.normal(k_v, (Cout,), dtype=jnp.float32))
    eps = 1e-5

    scale = gamma / jnp.sqrt(running_var + eps)
    shift = beta - running_mean * scale

    # Check both an exact-tile spatial size (16x16 -> HW=256) and a
    # non-128-multiple one (9x9 -> HW=81) to exercise masked tails / partial stores.
    for kx, (H, W) in ((k_x, (16, 16)), (k_x2, (9, 9))):
        x = jax.random.normal(kx, (N, Cin, H, W), dtype=jnp.float32)
        out = aspp_pooling(x, w, scale, shift)
        jax.block_until_ready(out)
        ref = _reference(x, w, scale, shift)
        assert out.shape == (N, Cout, H, W)
        assert jnp.allclose(out, ref, atol=1e-5, rtol=1e-5), (H, W)

    print("KERNEL_OK")
</pallas_src>

<mosaic_0001>
module attributes {stable_mosaic.version = 11 : i64} {
  func.func @kernel(%arg0: i32, %arg1: i32, %arg2: memref<1x4x256xf32, #tpu.memory_space<vmem>>, %arg3: memref<8x4xf32, #tpu.memory_space<vmem>>, %arg4: memref<8x1xf32, #tpu.memory_space<vmem>>, %arg5: memref<8x1xf32, #tpu.memory_space<vmem>>, %arg6: memref<1x8x1xf32, #tpu.memory_space<vmem>>, %arg7: memref<4x128xf32, #tpu.memory_space<vmem>>) attributes {dimension_semantics = [#tpu.dimension_semantics<parallel>, #tpu.dimension_semantics<arbitrary>], iteration_bounds = array<i64: 2, 1>, scalar_prefetch = 0 : i64, scratch_operands = 1 : i64, tpu.core_type = #tpu.core_type<tc>, window_params = [{transform_indices = @transform_0, window_bounds = array<i64: 1, 4, 256>}, {pipeline_mode = #tpu.pipeline_mode<synchronous>, transform_indices = @transform_1, window_bounds = array<i64: 8, 4>}, {pipeline_mode = #tpu.pipeline_mode<synchronous>, transform_indices = @transform_2, window_bounds = array<i64: 8, 1>}, {pipeline_mode = #tpu.pipeline_mode<synchronous>, transform_indices = @transform_3, window_bounds = array<i64: 8, 1>}, {transform_indices = @transform_4, window_bounds = array<i64: 1, 8, 1>}]} {
    %c0_i32 = arith.constant 0 : i32
    %0 = arith.cmpi eq, %arg1, %c0_i32 : i32
    %1 = arith.extui %0 : i1 to i32
    %c0_i32_0 = arith.constant 0 : i32
    %2 = arith.cmpi ne, %1, %c0_i32_0 : i32
    scf.if %2 {
      %cst = arith.constant 0.000000e+00 : f32
      %16 = vector.broadcast %cst : f32 to vector<4x128xf32>
      %c0_15 = arith.constant 0 : index
      %c0_16 = arith.constant 0 : index
      %17 = vector.load %arg7[%c0_15, %c0_16] : memref<4x128xf32, #tpu.memory_space<vmem>>, vector<4x128xf32>
      tpu.vector_store %arg7[%c0_15, %c0_16], %16 {strides = array<i32>} : memref<4x128xf32, #tpu.memory_space<vmem>>, vector<4x128xf32>,
    } else {
    }
    %c0 = arith.constant 0 : index
    %c0_1 = arith.constant 0 : index
    %c0_2 = arith.constant 0 : index
    %3 = vector.load %arg2[%c0, %c0_1, %c0_2] : memref<1x4x256xf32, #tpu.memory_space<vmem>>, vector<1x4x128xf32>
    %4 = vector.shape_cast %3 : vector<1x4x128xf32> to vector<4x128xf32>
    %c0_3 = arith.constant 0 : index
    %c0_4 = arith.constant 0 : index
    %5 = vector.load %arg7[%c0_3, %c0_4] : memref<4x128xf32, #tpu.memory_space<vmem>>, vector<4x128xf32>
    %6 = arith.addf %5, %4 : vector<4x128xf32>
    %c0_5 = arith.constant 0 : index
    %c0_6 = arith.constant 0 : index
    %7 = vector.load %arg7[%c0_5, %c0_6] : memref<4x128xf32, #tpu.memory_space<vmem>>, vector<4x128xf32>
    tpu.vector_store %arg7[%c0_5, %c0_6], %6 {strides = array<i32>} : memref<4x128xf32, #tpu.memory_space<vmem>>, vector<4x128xf32>,
    %c0_7 = arith.constant 0 : index
    %c0_8 = arith.constant 0 : index
    %c128 = arith.constant 128 : index
    %8 = vector.load %arg2[%c0_7, %c0_8, %c128] : memref<1x4x256xf32, #tpu.memory_space<vmem>>, vector<1x4x128xf32>
    %9 = vector.shape_cast %8 : vector<1x4x128xf32> to vector<4x128xf32>
    %c0_9 = arith.constant 0 : index
    %c0_10 = arith.constant 0 : index
    %10 = vector.load %arg7[%c0_9, %c0_10] : memref<4x128xf32, #tpu.memory_space<vmem>>, vector<4x128xf32>
    %11 = arith.addf %10, %9 : vector<4x128xf32>
    %c0_11 = arith.constant 0 : index
    %c0_12 = arith.constant 0 : index
    %12 = vector.load %arg7[%c0_11, %c0_12] : memref<4x128xf32, #tpu.memory_space<vmem>>, vector<4x128xf32>
    tpu.vector_store %arg7[%c0_11, %c0_12], %11 {strides = array<i32>} : memref<4x128xf32, #tpu.memory_space<vmem>>, vector<4x128xf32>,
    %c0_i32_13 = arith.constant 0 : i32
    %13 = arith.cmpi eq, %arg1, %c0_i32_13 : i32
    %14 = arith.extui %13 : i1 to i32
    %c0_i32_14 = arith.constant 0 : i32
    %15 = arith.cmpi ne, %14, %c0_i32_14 : i32
    scf.if %15 {
      %c0_15 = arith.constant 0 : index
      %c0_16 = arith.constant 0 : index
      %16 = vector.load %arg3[%c0_15, %c0_16] : memref<8x4xf32, #tpu.memory_space<vmem>>, vector<8x4xf32>
      %c0_17 = arith.constant 0 : index
      %c0_18 = arith.constant 0 : index
      %17 = vector.load %arg7[%c0_17, %c0_18] : memref<4x128xf32, #tpu.memory_space<vmem>>, vector<4x128xf32>
      %cst = arith.constant dense<0.000000e+00> : vector<8x128xf32>
      %18 = tpu.matmul %16, %17, %cst {dimension_numbers = #tpu.dot_dimension_numbers<[1], [0], [0], [1], [0, 0, 1, 1], [], []>} : vector<8x4xf32>, vector<4x128xf32>, vector<8x128xf32> -> vector<8x128xf32>
      %cst_19 = arith.constant dense<0.000000e+00> : vector<8xf32>
      %19 = vector.multi_reduction <add>, %18, %cst_19 [1] : vector<8x128xf32> to vector<8xf32>
      %20 = vector.shape_cast %19 : vector<8xf32> to vector<8x1xf32>
      %cst_20 = arith.constant 3.906250e-03 : f32
      %21 = vector.broadcast %cst_20 : f32 to vector<8x1xf32>
      %22 = arith.mulf %20, %21 : vector<8x1xf32>
      %c0_21 = arith.constant 0 : index
      %c0_22 = arith.constant 0 : index
      %23 = vector.load %arg4[%c0_21, %c0_22] : memref<8x1xf32, #tpu.memory_space<vmem>>, vector<8x1xf32>
      %24 = arith.mulf %22, %23 : vector<8x1xf32>
      %c0_23 = arith.constant 0 : index
      %c0_24 = arith.constant 0 : index
      %25 = vector.load %arg5[%c0_23, %c0_24] : memref<8x1xf32, #tpu.memory_space<vmem>>, vector<8x1xf32>
      %26 = arith.addf %24, %25 : vector<8x1xf32>
      %cst_25 = arith.constant 0.000000e+00 : f32
      %27 = vector.broadcast %cst_25 : f32 to vector<8x1xf32>
      %28 = arith.subf %27, %26 : vector<8x1xf32>
      %29 = math.exp %28 : vector<8x1xf32>
      %cst_26 = arith.constant 1.000000e+00 : f32
      %30 = vector.broadcast %cst_26 : f32 to vector<8x1xf32>
      %31 = arith.addf %30, %29 : vector<8x1xf32>
      %cst_27 = arith.constant 1.000000e+00 : f32
      %32 = vector.broadcast %cst_27 : f32 to vector<8x1xf32>
      %33 = arith.divf %32, %31 : vector<8x1xf32>
      %34 = arith.mulf %26, %33 : vector<8x1xf32>
      %c0_28 = arith.constant 0 : index
      %c0_29 = arith.constant 0 : index
      %c0_30 = arith.constant 0 : index
      %35 = vector.load %arg6[%c0_28, %c0_29, %c0_30] : memref<1x8x1xf32, #tpu.memory_space<vmem>>, vector<1x8x1xf32>
      %36 = vector.shape_cast %35 : vector<1x8x1xf32> to vector<8x1xf32>
      %37 = vector.shape_cast %34 : vector<8x1xf32> to vector<1x8x1xf32>
      tpu.vector_store %arg6[%c0_28, %c0_29, %c0_30], %37 {strides = array<i32>} : memref<1x8x1xf32, #tpu.memory_space<vmem>>, vector<1x8x1xf32>,
    } else {
    }
    return
  }
  func.func @transform_0(%arg0: i32, %arg1: i32) -> (i32, i32, i32) {
    %c0_i32 = arith.constant 0 : i32
    %c0_i32_0 = arith.constant 0 : i32
    return %arg0, %c0_i32, %arg1 : i32, i32, i32
  }
  func.func @transform_1(%arg0: i32, %arg1: i32) -> (i32, i32) {
    %c0_i32 = arith.constant 0 : i32
    %c0_i32_0 = arith.constant 0 : i32
    %c0_i32_1 = arith.constant 0 : i32
    return %c0_i32, %c0_i32_0 : i32, i32
  }
  func.func @transform_2(%arg0: i32, %arg1: i32) -> (i32, i32) {
    %c0_i32 = arith.constant 0 : i32
    %c0_i32_0 = arith.constant 0 : i32
    %c0_i32_1 = arith.constant 0 : i32
    return %c0_i32, %c0_i32_0 : i32, i32
  }
  func.func @transform_3(%arg0: i32, %arg1: i32) -> (i32, i32) {
    %c0_i32 = arith.constant 0 : i32
    %c0_i32_0 = arith.constant 0 : i32
    %c0_i32_1 = arith.constant 0 : i32
    return %c0_i32, %c0_i32_0 : i32, i32
  }
  func.func @transform_4(%arg0: i32, %arg1: i32) -> (i32, i32, i32) {
    %c0_i32 = arith.constant 0 : i32
    %c0_i32_0 = arith.constant 0 : i32
    %c0_i32_1 = arith.constant 0 : i32
    return %arg0, %c0_i32, %c0_i32_0 : i32, i32, i32
  }
}

</mosaic_0001>

<bundles_post_ra>
// kernel: tpu_custom_call.1
= control target key start
LH: loop header
LB: loop body
LE: loop exit
PB: predicated region body
PF: predicated region fallthrough
CT: control target
= control target key end

     0   :  { %s504_s15 = smov 0   ;;  %s506_s16 = smov 0   ;;  %s553_s0 = inlined_call_operand.vmem [shape: f32[2,4,256], index: 0, kind: input, shape index: {}]   ;;  %s554_s1 = inlined_call_operand.vmem [shape: f32[8,4], index: 1, kind: input, shape index: {}]   ;;  %s555_s2 = inlined_call_operand.vmem [shape: f32[8,1], index: 2, kind: input, shape index: {}]   ;;  %s556_s3 = inlined_call_operand.vmem [shape: f32[8,1], index: 3, kind: input, shape index: {}]   ;;  %s557_s4 = inlined_call_operand.vmem [shape: f32[2,8,1], index: 4, kind: output, shape index: {}]  }
   0x1   :  { %s508_s17 = smov 0  }
   0x2 LB: > { %s26_s18 = sadd.s32 1, %s471_s16  ;;  %p407_p0 = scmp.ge.s32.totalorder %s475_s17, 1  ;;  %s475_s17 = sphi %s508_s17, %s14_s17   ;;  %s471_s16 = sphi %s506_s16, %s559_s16   ;;  %s467_s15 = sphi %s504_s15, %s558_s15  }
   0x3   : > { %p28_p1 = scmp.ge.s32.totalorder %s26_s18, 2  ;;  %p181_p2 = scmp.lt.s32.totalorder %s475_s17, 3 }
   0x5   : > { %s561_s18 = smov (%p28_p1, %s26_s18), 0  ;;  %p182_p3 = pnand %p407_p0, %p181_p2 }
   0x6   : > { %p211_p4 = scmp.lt.s32.totalorder (!%p182_p3), %s467_s15, 1 }
   0x7   : > { %185 = sbr.rel (%p182_p3) target bundleno = 416 (0x1a0), region = 36 }
   0xc   : > { %v477_v0 = vmov 0.0   ;;  %vm478_vm0 = vmmov 0   ;;  %s563_s15 = smov (!%p211_p4, %s467_s15), 1  ;;  %vm246_vm1 = vcmask 1043456   ;;  %v240_v7 = vld [vmem:[%s554_s1] sm:$0xff]  ;;  %vm242_vm2 = vcmask 31744  }
   0xd   : > { %228 = vst [vmem:[#allocation2] sm:$0xf] %v477_v0  ;;  %418 = vmatprep.subr.mxu0 %v477_v0  ;;  %420 = vmatprep.mubr.msk.f32.mxu0 %vm478_vm0, %v477_v0  ;;  %s415_s19 = sshll.u32 %s563_s15, 3  ;;  %v323_v12 = vld [vmem:[%s555_s2] sm:$0xff]  ;;  %vm334_vm3 = vcmask 7168  }
   0xe   : > { %s218_s22 = scalar_lea.vmem %s553_s0, %s415_s19  ;;  %v325_v14 = vld [vmem:[%s556_s3] sm:$0xff]  ;;  %s223_s5 = scalar_lea.vmem %s557_s4, %s415_s19 }
   0xf   : > { %v229_v1 = vld [vmem:[%s218_s22] sm:$0xf]  ;;  %v233_v4 = vld [vmem:[%s218_s22 + $0x4] sm:$0xf] }
  0x14   : > { %v230_v2 = vld [vmem:[#allocation2] sm:$0xf] }
  0x15   : > { %v231_v3 = vadd.f32 %v230_v2, %v229_v1 }
  0x17   : > { %232 = vst [vmem:[#allocation2] sm:$0xf] %v231_v3 }
  0x1e   : > { %v234_v5 = vld [vmem:[#allocation2] sm:$0xf] }
  0x1f   : > { %v235_v6 = vadd.f32 %v234_v5, %v233_v4 }
  0x21   : > { %236 = vst [vmem:[#allocation2] sm:$0xf] %v235_v6 }
  0x28   : > { %v241_v8 = vld [vmem:[#allocation2] sm:$0xf] }
  0x29   : > { %419 = vmatpush3.msk.msra.mxu0 %vm246_vm1, %v241_v8 }
  0x2a   : > { %421 = vmatmul.mubr.msk.f32.vlgmr.msra.gmra.mxu0 %vm242_vm2, %v240_v7 }
  0xea   : > { %v316_v9 = vpop.f32.mrf.mxu0 }
  0xeb   : > { %320 = vadd.xlane.f32.xlu0 %v316_v9 }
  0xec   : > { %v422_v10 = vpop.f32.mrf.mxu0 }
 0x174   : > { %v321_v11 = vpop.xlane.xlu0 %320 }
 0x175   : > { %v322_v13 = vmul.f32 0.00390625, %v321_v11 }
 0x177   : > { %v324_v15 = vmul.f32 %v323_v12, %v322_v13 }
 0x179   : > { %v326_v16 = vadd.f32 %v325_v14, %v324_v15 }
 0x17b   : > { %v327_v17 = vsub.f32 0.0, %v326_v16 }
 0x17d   : > { %v328_v18 = vmul.f32 1.442695, %v327_v17 }
 0x17f   : > { %449 = vpow2.f32 %v328_v18 }
 0x18c   : > { %v450_v19 = vpop.eup %449 }
 0x18d   : > { %v330_v20 = vadd.f32 1.0, %v450_v19 }
 0x18f   : > { %451 = vrcp.f32 %v330_v20 }
 0x19c   : > { %v452_v21 = vpop.eup %451 }
 0x19d   : > { %v333_v22 = vmul.f32 %v452_v21, %v326_v16 }
 0x19f   : > { %335 = vst.msk [vmem:[%s223_s5] sm:$0xff] %vm334_vm3, %v333_v22 }
 0x1a0 PF: > { %s14_s17 = sadd.s32 1, %s475_s17   ;;  %s558_s15 = smov %s471_s16 }
 0x1a1   : > { %p11_p5 = scmp.ge.s32.totalorder %s14_s17, 4   ;;  %s559_s16 = smov %s561_s18 }
 0x1a3   :  { %13 = sbr.rel (!%p11_p5) target bundleno = 2 (0x2), region = 74 }

</bundles_post_ra>
